<compile_context>
chip_gen: v7x
topology: tpu7x:2x2x1
jax: 0.10.0
libtpu: 0.0.40
codegen_flags: <defaults>
</compile_context>

<pallas_src>
import itertools

import numpy as np
import jax
import jax.numpy as jnp
from jax.experimental import pallas as pl
from jax.experimental.pallas import tpu as pltpu

# ----------------------- GraphNetv2 config (small) --------------------------
B = 2              # batch
P = 4              # params (features per constituent)
N = 8              # n_constituents
NR = N * (N - 1)   # number of directed edges = 56
HID = 20           # hidden
DE = 20            # De
DO = 20            # Do
NT = 5             # n_targets
BN_EPS = 1e-5      # BatchNorm1d default eps

BN_ROWS = B * N        # 16   node rows
BE_ROWS = B * NR       # 112  edge rows
OUT_ROWS = 8           # padded output rows (>= B, sublane aligned)
OUT_COLS = 128         # lane-dense output width
SLAB_COLS = 128        # constant-slab lane width

# -------------------- constant-slab layout (static) -------------------------
# (name, rows, cols) — every constant lives at an 8-aligned row offset in a
# single (SLAB_ROWS, 128) f32 slab; columns are zero-padded to 128.
_SLAB_LAYOUT = (
    ("gather",  BE_ROWS, 2 * BN_ROWS),   # [kron(I_B,Rr^T) | kron(I_B,Rs^T)]
    ("scatter", BN_ROWS, BE_ROWS),       # kron(I_B, Rr)
    ("sumrows", OUT_ROWS, BN_ROWS),      # per-jet constituent sum (zero-padded rows)
    ("w1r", P, 4 * DE), ("w1s", P, 4 * DE), ("b1", 1, 4 * DE),   # fr1 (BN folded)
    ("w2", 4 * DE, 2 * DE), ("b2", 1, 2 * DE),                   # fr2
    ("w3", 2 * DE, DE), ("b3", 1, DE),                           # fr3
    ("wo1x", P, 2 * HID), ("wo1e", DE, 2 * HID), ("bo1", 1, 2 * HID),  # fo1 (BN folded)
    ("wo2", 2 * HID, HID), ("bo2", 1, HID),                      # fo2
    ("wo3", HID, DO), ("bo3", 1, DO),                            # fo3
    ("wfc", DO, OUT_COLS), ("bfc", 1, OUT_COLS),                 # fc1@fc2@fc3 folded
)


def _compute_offsets():
    offs, row = {}, 0
    for name, rows, cols in _SLAB_LAYOUT:
        offs[name] = (row, rows, cols)
        row += -(-rows // 8) * 8          # keep every start 8-aligned
    return offs, row


_SLAB_OFFS, SLAB_ROWS = _compute_offsets()   # SLAB_ROWS == 448  (~224 KiB f32)


# ------------------------------- kernel -------------------------------------
def graphnet_kernel(x_ref, slab_ref, out_ref):
    def cst(name):
        off, rows, cols = _SLAB_OFFS[name]
        return slab_ref[off:off + rows, 0:cols]     # static slice, zero-cost view

    relu = lambda t: jnp.maximum(t, 0.0)
    dot = lambda a, b: jnp.dot(a, b, preferred_element_type=jnp.float32)

    x = x_ref[...]                                   # (B*N, P), raw (BN folded into weights)

    # ---- edge block ----
    # fr1 reassociated: gather after the weight multiply; BN scale folded into
    # w1r/w1s rows, BN shift + fr1 bias folded into b1.
    a = dot(x, cst("w1r"))                           # (16, 80)
    b = dot(x, cst("w1s"))                           # (16, 80)   independent of `a`
    ab = jnp.concatenate([a, b], axis=0)             # (32, 80)   free sublane stack
    e = relu(dot(cst("gather"), ab) + cst("b1"))     # (112, 80)  fr1
    e = relu(dot(e, cst("w2")) + cst("b2"))          # (112, 40)  fr2
    e = relu(dot(e, cst("w3")) + cst("b3"))          # (112, 20)  fr3
    ebar = dot(cst("scatter"), e)                    # (16, 20)   E @ Rr^T

    # ---- node block ---- (cat([x, Ebar], ch) folded into split weights)
    c = relu(dot(x, cst("wo1x")) + dot(ebar, cst("wo1e")) + cst("bo1"))   # (16, 40)
    c = relu(dot(c, cst("wo2")) + cst("bo2"))        # (16, 20)
    o = relu(dot(c, cst("wo3")) + cst("bo3"))        # (16, 20)

    # per-jet sum (rows >= B are zero) then folded fc1/fc2/fc3 readout,
    # produced directly as a lane-dense (8, 128) slab.
    nsum = dot(cst("sumrows"), o)                    # (8, 20)
    out_ref[...] = dot(nsum, cst("wfc")) + cst("bfc")   # (8, 128) unmasked store


# ------------------------------- wrapper -------------------------------------
@jax.jit
def graphnet_forward(x, slab):
    """x: (B, P, N) in the torch layout. Returns (B, n_targets)."""
    x_flat = jnp.transpose(x, (0, 2, 1)).reshape(B * N, P)   # channel-last rows
    out_pad = pl.pallas_call(
        graphnet_kernel,
        out_shape=jax.ShapeDtypeStruct((OUT_ROWS, OUT_COLS), jnp.float32),
        in_specs=[pl.BlockSpec(memory_space=pltpu.MemorySpace.VMEM),
                  pl.BlockSpec(memory_space=pltpu.MemorySpace.VMEM)],
        out_specs=pl.BlockSpec(memory_space=pltpu.MemorySpace.VMEM),
    )(x_flat, slab)
    return out_pad[:B, :NT]


# ------------------- parameter construction & reference ----------------------
def assign_matrices(n):
    """Same construction as GraphNetv2.assign_matrices (receiver/sender)."""
    nr = n * (n - 1)
    Rr = np.zeros((n, nr), dtype=np.float64)
    Rs = np.zeros((n, nr), dtype=np.float64)
    pairs = [p for p in itertools.product(range(n), range(n)) if p[0] != p[1]]
    for i, (r, s) in enumerate(pairs):
        Rr[r, i] = 1.0
        Rs[s, i] = 1.0
    return Rr, Rs


def make_params(key):
    """Returns (torch-layout params as float64 numpy, packed f32 constant slab)."""
    ks = iter(jax.random.split(key, 24))

    def rnd(shape, scale=0.2):
        return np.asarray(scale * jax.random.normal(next(ks), shape), dtype=np.float64)

    Rr, Rs = assign_matrices(N)

    tp = dict(
        Rr=Rr, Rs=Rs,
        bn_gamma=np.asarray(1.0 + 0.1 * jax.random.normal(next(ks), (P,)), np.float64),
        bn_beta=rnd((P,), 0.1), bn_mean=rnd((P,), 0.1),
        bn_var=np.asarray(jax.random.uniform(next(ks), (P,), jnp.float32, 0.5, 1.5), np.float64),
        fr1_w=rnd((4 * DE, 2 * P)), fr1_b=rnd((4 * DE,)),
        fr2_w=rnd((2 * DE, 4 * DE)), fr2_b=rnd((2 * DE,)),
        fr3_w=rnd((DE, 2 * DE)), fr3_b=rnd((DE,)),
        fo1_w=rnd((2 * HID, P + DE)), fo1_b=rnd((2 * HID,)),
        fo2_w=rnd((HID, 2 * HID)), fo2_b=rnd((HID,)),
        fo3_w=rnd((DO, HID)), fo3_b=rnd((DO,)),
        fc1_w=rnd((5 * NT, DO)), fc1_b=rnd((5 * NT,)),
        fc2_w=rnd((3 * NT, 5 * NT)), fc2_b=rnd((3 * NT,)),
        fc3_w=rnd((NT, 3 * NT)), fc3_b=rnd((NT,)),
    )

    # ---- fold BatchNorm (eval) into first-layer weights/biases (float64) ----
    s = tp["bn_gamma"] / np.sqrt(tp["bn_var"] + BN_EPS)   # per-channel scale
    t = tp["bn_beta"] - tp["bn_mean"] * s                 # per-channel shift

    W1r = tp["fr1_w"][:, :P].T
    W1s = tp["fr1_w"][:, P:].T
    Wo1x = tp["fo1_w"][:, :P].T
    Wo1e = tp["fo1_w"][:, P:].T

    # ---- fold the activation-free fc_fixed1/2/3 chain ----
    Wfc = tp["fc1_w"].T @ tp["fc2_w"].T @ tp["fc3_w"].T                       # (DO, NT)
    bfc = (tp["fc1_b"] @ tp["fc2_w"].T + tp["fc2_b"]) @ tp["fc3_w"].T + tp["fc3_b"]
    wfc_pad = np.zeros((DO, OUT_COLS), np.float64); wfc_pad[:, :NT] = Wfc
    bfc_pad = np.zeros((1, OUT_COLS), np.float64);  bfc_pad[0, :NT] = bfc

    # ---- batch-block-diagonal graph matrices (gather / scatter / sum) ----
    eyeB = np.eye(B)
    gather = np.hstack([np.kron(eyeB, Rr.T), np.kron(eyeB, Rs.T)])   # (B*NR, 2*B*N)
    scatter = np.kron(eyeB, Rr)                                      # (B*N, B*NR)
    sumrows = np.zeros((OUT_ROWS, B * N), np.float64)
    sumrows[:B] = np.kron(eyeB, np.ones((1, N)))                     # zero-padded rows

    consts = {
        "gather": gather, "scatter": scatter, "sumrows": sumrows,
        "w1r": s[:, None] * W1r, "w1s": s[:, None] * W1s,
        "b1": (tp["fr1_b"] + t @ W1r + t @ W1s)[None, :],
        "w2": tp["fr2_w"].T, "b2": tp["fr2_b"][None, :],
        "w3": tp["fr3_w"].T, "b3": tp["fr3_b"][None, :],
        "wo1x": s[:, None] * Wo1x, "wo1e": Wo1e,
        "bo1": (tp["fo1_b"] + t @ Wo1x)[None, :],
        "wo2": tp["fo2_w"].T, "bo2": tp["fo2_b"][None, :],
        "wo3": tp["fo3_w"].T, "bo3": tp["fo3_b"][None, :],
        "wfc": wfc_pad, "bfc": bfc_pad,
    }

    slab = np.zeros((SLAB_ROWS, SLAB_COLS), np.float32)
    for name, rows, cols in _SLAB_LAYOUT:
        off, _, _ = _SLAB_OFFS[name]
        arr = np.asarray(consts[name], np.float32)
        assert arr.shape == (rows, cols), (name, arr.shape, (rows, cols))
        slab[off:off + rows, :cols] = arr

    return tp, jnp.asarray(slab)


def ref_forward(x, tp):
    """Exact float64 numpy reference in the torch layout (x: (B, P, N))."""
    relu = lambda v: np.maximum(v, 0.0)
    Rr, Rs = tp["Rr"], tp["Rs"]

    inv = 1.0 / np.sqrt(tp["bn_var"] + BN_EPS)
    xbn = ((x - tp["bn_mean"][None, :, None]) * (inv * tp["bn_gamma"])[None, :, None]
           + tp["bn_beta"][None, :, None])

    tmul = lambda a, m: np.einsum("bcl,lm->bcm", a, m)
    conv = lambda h, wn, bn: np.einsum("oc,bcl->bol", tp[wn], h) + tp[bn][None, :, None]

    Orr = tmul(xbn, Rr)
    Ors = tmul(xbn, Rs)
    Bc = np.concatenate([Orr, Ors], axis=1)
    E = relu(conv(relu(conv(relu(conv(Bc, "fr1_w", "fr1_b")),
                            "fr2_w", "fr2_b")), "fr3_w", "fr3_b"))
    Ebar = tmul(E, Rr.T)
    C = np.concatenate([xbn, Ebar], axis=1)
    O = relu(conv(relu(conv(relu(conv(C, "fo1_w", "fo1_b")),
                            "fo2_w", "fo2_b")), "fo3_w", "fo3_b"))
    Nsum = np.sum(O, axis=2)                                   # (B, DO)
    h = Nsum @ tp["fc1_w"].T + tp["fc1_b"]
    h = h @ tp["fc2_w"].T + tp["fc2_b"]
    return h @ tp["fc3_w"].T + tp["fc3_b"]


# --------------------------------- main --------------------------------------
if __name__ == "__main__":
    key = jax.random.PRNGKey(0)
    kx, kp_key = jax.random.split(key)

    x = jax.random.normal(kx, (B, P, N), dtype=jnp.float32)
    torch_params, const_slab = make_params(kp_key)

    out = jax.block_until_ready(graphnet_forward(x, const_slab))
    ref = ref_forward(np.asarray(x, np.float64), torch_params)

    # Kernel uses default (single-pass bf16) MXU precision per the perf review;
    # tolerance vs the exact float64 reference reflects bf16 input rounding
    # accumulated over the ~9-matmul serial chain.
    np.testing.assert_allclose(np.asarray(out, np.float64), ref,
                               atol=3e-2, rtol=3e-2)
    print("KERNEL_OK")
</pallas_src>

<mosaic_0001>
module attributes {stable_mosaic.version = 11 : i64} {
  func.func @graphnet_kernel(%arg0: memref<16x4xf32, #tpu.memory_space<vmem>>, %arg1: memref<448x128xf32, #tpu.memory_space<vmem>>, %arg2: memref<8x128xf32, #tpu.memory_space<vmem>>) attributes {dimension_semantics = [], scalar_prefetch = 0 : i64, scratch_operands = 0 : i64, tpu.core_type = #tpu.core_type<tc>} {
    %c0 = arith.constant 0 : index
    %c0_0 = arith.constant 0 : index
    %0 = vector.load %arg0[%c0, %c0_0] : memref<16x4xf32, #tpu.memory_space<vmem>>, vector<16x4xf32>
    %c136 = arith.constant 136 : index
    %c0_1 = arith.constant 0 : index
    %1 = vector.load %arg1[%c136, %c0_1] : memref<448x128xf32, #tpu.memory_space<vmem>>, vector<4x80xf32>
    %cst = arith.constant dense<0.000000e+00> : vector<16x80xf32>
    %2 = tpu.matmul %0, %1, %cst {dimension_numbers = #tpu.dot_dimension_numbers<[1], [0], [0], [1], [0, 0, 1, 1], [], []>} : vector<16x4xf32>, vector<4x80xf32>, vector<16x80xf32> -> vector<16x80xf32>
    %c144 = arith.constant 144 : index
    %c0_2 = arith.constant 0 : index
    %3 = vector.load %arg1[%c144, %c0_2] : memref<448x128xf32, #tpu.memory_space<vmem>>, vector<4x80xf32>
    %cst_3 = arith.constant dense<0.000000e+00> : vector<16x80xf32>
    %4 = tpu.matmul %0, %3, %cst_3 {dimension_numbers = #tpu.dot_dimension_numbers<[1], [0], [0], [1], [0, 0, 1, 1], [], []>} : vector<16x4xf32>, vector<4x80xf32>, vector<16x80xf32> -> vector<16x80xf32>
    %5 = tpu.concatenate %2, %4 in 0 : vector<16x80xf32>, vector<16x80xf32> -> vector<32x80xf32>
    %c0_4 = arith.constant 0 : index
    %c0_5 = arith.constant 0 : index
    %6 = vector.load %arg1[%c0_4, %c0_5] : memref<448x128xf32, #tpu.memory_space<vmem>>, vector<112x32xf32>
    %cst_6 = arith.constant dense<0.000000e+00> : vector<112x80xf32>
    %7 = tpu.matmul %6, %5, %cst_6 {dimension_numbers = #tpu.dot_dimension_numbers<[1], [0], [0], [1], [0, 0, 1, 1], [], []>} : vector<112x32xf32>, vector<32x80xf32>, vector<112x80xf32> -> vector<112x80xf32>
    %c152 = arith.constant 152 : index
    %c0_7 = arith.constant 0 : index
    %8 = vector.load %arg1[%c152, %c0_7] : memref<448x128xf32, #tpu.memory_space<vmem>>, vector<1x80xf32>
    %9 = vector.broadcast %8 : vector<1x80xf32> to vector<112x80xf32>
    %10 = arith.addf %7, %9 : vector<112x80xf32>
    %cst_8 = arith.constant 0.000000e+00 : f32
    %11 = vector.broadcast %cst_8 : f32 to vector<112x80xf32>
    %12 = arith.maximumf %10, %11 : vector<112x80xf32>
    %c160 = arith.constant 160 : index
    %c0_9 = arith.constant 0 : index
    %13 = vector.load %arg1[%c160, %c0_9] : memref<448x128xf32, #tpu.memory_space<vmem>>, vector<80x40xf32>
    %cst_10 = arith.constant dense<0.000000e+00> : vector<112x40xf32>
    %14 = tpu.matmul %12, %13, %cst_10 {dimension_numbers = #tpu.dot_dimension_numbers<[1], [0], [0], [1], [0, 0, 1, 1], [], []>} : vector<112x80xf32>, vector<80x40xf32>, vector<112x40xf32> -> vector<112x40xf32>
    %c240 = arith.constant 240 : index
    %c0_11 = arith.constant 0 : index
    %15 = vector.load %arg1[%c240, %c0_11] : memref<448x128xf32, #tpu.memory_space<vmem>>, vector<1x40xf32>
    %16 = vector.broadcast %15 : vector<1x40xf32> to vector<112x40xf32>
    %17 = arith.addf %14, %16 : vector<112x40xf32>
    %cst_12 = arith.constant 0.000000e+00 : f32
    %18 = vector.broadcast %cst_12 : f32 to vector<112x40xf32>
    %19 = arith.maximumf %17, %18 : vector<112x40xf32>
    %c248 = arith.constant 248 : index
    %c0_13 = arith.constant 0 : index
    %20 = vector.load %arg1[%c248, %c0_13] : memref<448x128xf32, #tpu.memory_space<vmem>>, vector<40x20xf32>
    %cst_14 = arith.constant dense<0.000000e+00> : vector<112x20xf32>
    %21 = tpu.matmul %19, %20, %cst_14 {dimension_numbers = #tpu.dot_dimension_numbers<[1], [0], [0], [1], [0, 0, 1, 1], [], []>} : vector<112x40xf32>, vector<40x20xf32>, vector<112x20xf32> -> vector<112x20xf32>
    %c288 = arith.constant 288 : index
    %c0_15 = arith.constant 0 : index
    %22 = vector.load %arg1[%c288, %c0_15] : memref<448x128xf32, #tpu.memory_space<vmem>>, vector<1x20xf32>
    %23 = vector.broadcast %22 : vector<1x20xf32> to vector<112x20xf32>
    %24 = arith.addf %21, %23 : vector<112x20xf32>
    %cst_16 = arith.constant 0.000000e+00 : f32
    %25 = vector.broadcast %cst_16 : f32 to vector<112x20xf32>
    %26 = arith.maximumf %24, %25 : vector<112x20xf32>
    %c112 = arith.constant 112 : index
    %c0_17 = arith.constant 0 : index
    %27 = vector.load %arg1[%c112, %c0_17] : memref<448x128xf32, #tpu.memory_space<vmem>>, vector<16x112xf32>
    %cst_18 = arith.constant dense<0.000000e+00> : vector<16x20xf32>
    %28 = tpu.matmul %27, %26, %cst_18 {dimension_numbers = #tpu.dot_dimension_numbers<[1], [0], [0], [1], [0, 0, 1, 1], [], []>} : vector<16x112xf32>, vector<112x20xf32>, vector<16x20xf32> -> vector<16x20xf32>
    %c296 = arith.constant 296 : index
    %c0_19 = arith.constant 0 : index
    %29 = vector.load %arg1[%c296, %c0_19] : memref<448x128xf32, #tpu.memory_space<vmem>>, vector<4x40xf32>
    %cst_20 = arith.constant dense<0.000000e+00> : vector<16x40xf32>
    %30 = tpu.matmul %0, %29, %cst_20 {dimension_numbers = #tpu.dot_dimension_numbers<[1], [0], [0], [1], [0, 0, 1, 1], [], []>} : vector<16x4xf32>, vector<4x40xf32>, vector<16x40xf32> -> vector<16x40xf32>
    %c304 = arith.constant 304 : index
    %c0_21 = arith.constant 0 : index
    %31 = vector.load %arg1[%c304, %c0_21] : memref<448x128xf32, #tpu.memory_space<vmem>>, vector<20x40xf32>
    %cst_22 = arith.constant dense<0.000000e+00> : vector<16x40xf32>
    %32 = tpu.matmul %28, %31, %cst_22 {dimension_numbers = #tpu.dot_dimension_numbers<[1], [0], [0], [1], [0, 0, 1, 1], [], []>} : vector<16x20xf32>, vector<20x40xf32>, vector<16x40xf32> -> vector<16x40xf32>
    %33 = arith.addf %30, %32 : vector<16x40xf32>
    %c328 = arith.constant 328 : index
    %c0_23 = arith.constant 0 : index
    %34 = vector.load %arg1[%c328, %c0_23] : memref<448x128xf32, #tpu.memory_space<vmem>>, vector<1x40xf32>
    %35 = vector.broadcast %34 : vector<1x40xf32> to vector<16x40xf32>
    %36 = arith.addf %33, %35 : vector<16x40xf32>
    %cst_24 = arith.constant 0.000000e+00 : f32
    %37 = vector.broadcast %cst_24 : f32 to vector<16x40xf32>
    %38 = arith.maximumf %36, %37 : vector<16x40xf32>
    %c336 = arith.constant 336 : index
    %c0_25 = arith.constant 0 : index
    %39 = vector.load %arg1[%c336, %c0_25] : memref<448x128xf32, #tpu.memory_space<vmem>>, vector<40x20xf32>
    %cst_26 = arith.constant dense<0.000000e+00> : vector<16x20xf32>
    %40 = tpu.matmul %38, %39, %cst_26 {dimension_numbers = #tpu.dot_dimension_numbers<[1], [0], [0], [1], [0, 0, 1, 1], [], []>} : vector<16x40xf32>, vector<40x20xf32>, vector<16x20xf32> -> vector<16x20xf32>
    %c376 = arith.constant 376 : index
    %c0_27 = arith.constant 0 : index
    %41 = vector.load %arg1[%c376, %c0_27] : memref<448x128xf32, #tpu.memory_space<vmem>>, vector<1x20xf32>
    %42 = vector.broadcast %41 : vector<1x20xf32> to vector<16x20xf32>
    %43 = arith.addf %40, %42 : vector<16x20xf32>
    %cst_28 = arith.constant 0.000000e+00 : f32
    %44 = vector.broadcast %cst_28 : f32 to vector<16x20xf32>
    %45 = arith.maximumf %43, %44 : vector<16x20xf32>
    %c384 = arith.constant 384 : index
    %c0_29 = arith.constant 0 : index
    %46 = vector.load %arg1[%c384, %c0_29] : memref<448x128xf32, #tpu.memory_space<vmem>>, vector<20x20xf32>
    %cst_30 = arith.constant dense<0.000000e+00> : vector<16x20xf32>
    %47 = tpu.matmul %45, %46, %cst_30 {dimension_numbers = #tpu.dot_dimension_numbers<[1], [0], [0], [1], [0, 0, 1, 1], [], []>} : vector<16x20xf32>, vector<20x20xf32>, vector<16x20xf32> -> vector<16x20xf32>
    %c408 = arith.constant 408 : index
    %c0_31 = arith.constant 0 : index
    %48 = vector.load %arg1[%c408, %c0_31] : memref<448x128xf32, #tpu.memory_space<vmem>>, vector<1x20xf32>
    %49 = vector.broadcast %48 : vector<1x20xf32> to vector<16x20xf32>
    %50 = arith.addf %47, %49 : vector<16x20xf32>
    %cst_32 = arith.constant 0.000000e+00 : f32
    %51 = vector.broadcast %cst_32 : f32 to vector<16x20xf32>
    %52 = arith.maximumf %50, %51 : vector<16x20xf32>
    %c128 = arith.constant 128 : index
    %c0_33 = arith.constant 0 : index
    %53 = vector.load %arg1[%c128, %c0_33] : memref<448x128xf32, #tpu.memory_space<vmem>>, vector<8x16xf32>
    %cst_34 = arith.constant dense<0.000000e+00> : vector<8x20xf32>
    %54 = tpu.matmul %53, %52, %cst_34 {dimension_numbers = #tpu.dot_dimension_numbers<[1], [0], [0], [1], [0, 0, 1, 1], [], []>} : vector<8x16xf32>, vector<16x20xf32>, vector<8x20xf32> -> vector<8x20xf32>
    %c416 = arith.constant 416 : index
    %c0_35 = arith.constant 0 : index
    %55 = vector.load %arg1[%c416, %c0_35] : memref<448x128xf32, #tpu.memory_space<vmem>>, vector<20x128xf32>
    %cst_36 = arith.constant dense<0.000000e+00> : vector<8x128xf32>
    %56 = tpu.matmul %54, %55, %cst_36 {dimension_numbers = #tpu.dot_dimension_numbers<[1], [0], [0], [1], [0, 0, 1, 1], [], []>} : vector<8x20xf32>, vector<20x128xf32>, vector<8x128xf32> -> vector<8x128xf32>
    %c440 = arith.constant 440 : index
    %c0_37 = arith.constant 0 : index
    %57 = vector.load %arg1[%c440, %c0_37] : memref<448x128xf32, #tpu.memory_space<vmem>>, vector<1x128xf32>
    %58 = vector.broadcast %57 : vector<1x128xf32> to vector<8x128xf32>
    %59 = arith.addf %56, %58 : vector<8x128xf32>
    %c0_38 = arith.constant 0 : index
    %c0_39 = arith.constant 0 : index
    %60 = vector.load %arg2[%c0_38, %c0_39] : memref<8x128xf32, #tpu.memory_space<vmem>>, vector<8x128xf32>
    tpu.vector_store %arg2[%c0_38, %c0_39], %59 {strides = array<i32>} : memref<8x128xf32, #tpu.memory_space<vmem>>, vector<8x128xf32>,
    return
  }
}

</mosaic_0001>

<bundles_post_ra>
// kernel: graphnet_forward.1
= control target key start
LH: loop header
LB: loop body
LE: loop exit
PB: predicated region body
PF: predicated region fallthrough
CT: control target
= control target key end

     0   :  { %7 = vsyncpa [#allocation3], 0  ;;  %s1918_s9 = smov [#allocation2]   ;;  %s2038_s0 = inlined_call_operand.vmem [shape: f32[16,4], index: 0, kind: input, shape index: {}]   ;;  %s2039_s1 = inlined_call_operand.hbm [shape: f32[448,128], index: 1, kind: input, shape index: {}]   ;;  %s2040_s2 = inlined_call_operand.vmem [shape: f32[8,128], index: 2, kind: output, shape index: {}]  }
   0x1   :  { %s15_s10 = sshll.u32 %s1918_s9, 4  ;;  %s1894_s13 = scalar_lea.hbm %s2039_s1, 7168  ;;  %s16_s10 = int_to_ptr.vmem [resolvable:$true] %s15_s10 }
   0x2   :  { %p1895_p0 = scmp.ne.s32.totalorder %s2039_s1, %s1894_s13  ;;  %p1898_p1 = scmp.lt.u32.totalorder %s1894_s13, %s2039_s1 }
   0x4   :  { %p1900_p2 = pnand %p1898_p1, %p1895_p0 }
   0x6   :  { %1903 = shalt.err (!%p1900_p2)
}
   0x7   :  { %s1904_s18 = scalar_lea.vmem %s16_s10, 7168  ;;  %p1909_p4 = scmp.lt.s32.totalorder %s16_s10, %s16_s10 }
   0x8   :  { %p1905_p3 = scmp.ne.s32.totalorder %s16_s10, %s1904_s18  ;;  %p1910_p5 = scmp.lt.s32.totalorder %s1904_s18, %s1904_s18 }
   0xa   :  { %p1911_p6 = por %p1910_p5, %p1909_p4 }
   0xc   :  { %p1912_p7 = pnand %p1911_p6, %p1905_p3 }
   0xe   :  { %1915 = shalt.err (!%p1912_p7)
}
   0xf   :  { %s1919_s19 = smov 128   ;;  %s1920_s20 = smov 8  }
  0x10   :  { %21 = dma.hbm_to_vmem [thread:$0]  %s2039_s1, 7168, %s16_s10, [#allocation3], %s1919_s19, %s1919_s19, %s1920_s20  }
  0x11   :  { %1916 = dma.done.wait [#allocation3], 7168  }
  0x12   :  { %1917 = vsyncadd [#allocation3], 4294960128  ;;  %vm35_vm0 = vcmask 1043456   ;;  %vm28_vm1 = vcmask 31744   ;;  %v27_v0 = vld [vmem:[#allocation2 + $0x88] sm:$0xf] }
  0x13   :  { %v1954_v1 = vld [vmem:[%s2038_s0] sm:$0xff]  ;;  %v1959_v2 = vld [vmem:[%s2038_s0 + $0x8] sm:$0xff]  ;;  %1606 = vmatprep.subr.msk.mxu0 %vm35_vm0, %v27_v0  ;;  %v114_v3 = vld [vmem:[#allocation2 + $0x90] sm:$0xf]  ;;  %vm212_vm2 = vcmask 261120   ;;  %vm419_vm3 = vcmask 654336  }
  0x14   :  { %1608 = vmatprep.mubr.msk.f32.mxu0 %vm28_vm1, %v1954_v1  ;;  %1607 = vmatpush3.msk.msra.mxu0 %vm35_vm0, %v27_v0  ;;  %v193_v4 = vld [vmem:[#allocation2] sm:$0xff]  ;;  %v405_v6 = vld [vmem:[#allocation2 + $0xa8] sm:$0xff]  ;;  %v406_v7 = vld [vmem:[#allocation2 + $0xb0] sm:$0xff]  ;;  %vm621_vm4 = vcmask 326656   ;;  %vm815_vm5 = vcmask 916480   ;;  %vm901_vm6 = vcmask 162816  }
  0x15   :  { %1611 = vmatprep.subr.msk.mxu1 %vm35_vm0, %v114_v3  ;;  %1609 = vmatmul.mubr.msk.f32.vlgmr.msra.gmra.mrb[0].mxu0 %vm28_vm1, %v1959_v2  ;;  %v404_v5 = vld [vmem:[#allocation2 + $0xa0] sm:$0xff]  ;;  %v407_v9 = vld [vmem:[#allocation2 + $0xb8] sm:$0xff]  ;;  %v409_v12 = vld [vmem:[#allocation2 + $0xc8] sm:$0xff]  ;;  %vm1922_vm7 = vmmov 0   ;;  %vm1261_vm8 = vcmask 130048  }
  0x16   :  { %1612 = vmatpush3.msk.msra.mxu1 %vm35_vm0, %v114_v3  ;;  %1613 = vmatprep.mubr.msk.f32.mxu1 %vm28_vm1, %v1954_v1  ;;  %v1808_v8 = vpack.c.bf16 %v405_v6, %v404_v5  ;;  %v1812_v10 = vpack.c.bf16 %v407_v9, %v406_v7  ;;  %v408_v11 = vld [vmem:[#allocation2 + $0xc0] sm:$0xff]  ;;  %v410_v14 = vld [vmem:[#allocation2 + $0xd0] sm:$0xff]  ;;  %v411_v15 = vld [vmem:[#allocation2 + $0xd8] sm:$0xff] }
  0x17   :  { %1614 = vmatmul.mubr.msk.f32.vlgmr.msra.gmra.mrb[0].mxu1 %vm28_vm1, %v1959_v2  ;;  %1624 = vmatprep.mubr.msk.f32.mxu0 %vm212_vm2, %v193_v4  ;;  %v1816_v13 = vpack.c.bf16 %v409_v12, %v408_v11  ;;  %v1820_v16 = vpack.c.bf16 %v411_v15, %v410_v14  ;;  %v194_v23 = vld [vmem:[#allocation2 + $0x8] sm:$0xff]  ;;  %v195_v24 = vld [vmem:[#allocation2 + $0x10] sm:$0xff]  ;;  %v196_v25 = vld [vmem:[#allocation2 + $0x18] sm:$0xff] }
  0x18   :  { %1809 = vmatprep.subr.bf16.mxu1 %v1808_v8  ;;  %v197_v26 = vld [vmem:[#allocation2 + $0x20] sm:$0xff]  ;;  %v198_v27 = vld [vmem:[#allocation2 + $0x28] sm:$0xff]  ;;  %v199_v28 = vld [vmem:[#allocation2 + $0x30] sm:$0xff] }
  0x19   :  { %1811 = vmatpush3.bf16.msra.mxu1 %v1808_v8  ;;  %v200_v29 = vld [vmem:[#allocation2 + $0x38] sm:$0xff]  ;;  %v201_v30 = vld [vmem:[#allocation2 + $0x40] sm:$0xff]  ;;  %v202_v31 = vld [vmem:[#allocation2 + $0x48] sm:$0xff] }
  0x1a   :  { %1813 = vmatprep.subr.bf16.mxu1 %v1812_v10  ;;  %v203_v32 = vld [vmem:[#allocation2 + $0x50] sm:$0xff]  ;;  %v204_v33 = vld [vmem:[#allocation2 + $0x58] sm:$0xff]  ;;  %v205_v34 = vld [vmem:[#allocation2 + $0x60] sm:$0xff] }
  0x1b   :  { %v206_v35 = vld [vmem:[#allocation2 + $0x68] sm:$0xff]  ;;  %v412_v36 = vld [vmem:[#allocation2 + $0xe0] sm:$0xff]  ;;  %v611_v39 = vld [vmem:[#allocation2 + $0xf8] sm:$0xff] }
  0x1c   :  { %v413_v37 = vld [vmem:[#allocation2 + $0xe8] sm:$0xff]  ;;  %v612_v40 = vld [vmem:[#allocation2 + $0x100] sm:$0xff]  ;;  %v614_v43 = vld [vmem:[#allocation2 + $0x110] sm:$0xff] }
  0x1d   :  { %1815 = vmatpush3.bf16.msra.mxu1 %v1812_v10  ;;  %v1824_v38 = vpack.c.bf16 %v413_v37, %v412_v36  ;;  %v613_v41 = vld [vmem:[#allocation2 + $0x108] sm:$0xff]  ;;  %v1828_v42 = vpack.c.bf16 %v612_v40, %v611_v39  ;;  %v615_v45 = vld [vmem:[#allocation2 + $0x118] sm:$0xff] }
  0x1e   :  { %1817 = vmatprep.subr.bf16.mxu1 %v1816_v13  ;;  %v1832_v44 = vpack.c.bf16 %v614_v43, %v613_v41  ;;  %v1431_v46 = vld [vmem:[#allocation2 + $0x98] ss:$0 sm:$0xff] }
  0x21   :  { %1819 = vmatpush3.bf16.msra.mxu1 %v1816_v13 }
  0x22   :  { %1821 = vmatprep.subr.bf16.mxu1 %v1820_v16 }
  0x25   :  { %1823 = vmatpush3.bf16.msra.mxu1 %v1820_v16 }
  0x26   :  { %1825 = vmatprep.subr.bf16.mxu1 %v1824_v38 }
  0x29   :  { %1827 = vmatpush3.bf16.msra.mxu1 %v1824_v38 }
  0xe8   :  { %v1610_v17 = vpop.f32.mrb[0].mxu0 }
  0xe9   :  { %v105_v18 = vpop.f32.mrb[1].mxu0 }
  0xea   :  { %v1800_v19 = vpack.c.bf16 %v1610_v17, %v105_v18  ;;  %v1615_v20 = vpop.f32.mrb[0].mxu1 }
  0xeb   :  { %v184_v21 = vpop.f32.mrb[1].mxu1 }
  0xec   :  { %v1804_v22 = vpack.c.bf16 %v1615_v20, %v184_v21  ;;  %1801 = vmatprep.subr.bf16.mxu0 %v1800_v19 }
  0xed   :  { %1803 = vmatpush3.bf16.msra.mxu0 %v1800_v19 }
  0xee   :  { %1805 = vmatprep.subr.bf16.mxu0 %v1804_v22 }
  0xf1   :  { %1807 = vmatpush3.bf16.msra.mxu0 %v1804_v22 }
  0xf2   :  { %1829 = vmatprep.subr.bf16.mxu0 %v1828_v42 }
  0xf4   :  { %1625 = vmatmul.mubr.msk.f32.vlgmr.msra.gmra.mrb[2].mxu0 %vm212_vm2, %v194_v23 }
  0xf5   :  { %1627 = vmatprep.mubr.msk.f32.mxu0 %vm212_vm2, %v195_v24  ;;  %1831 = vmatpush3.bf16.msra.mxu0 %v1828_v42 }
  0xf6   :  { %1833 = vmatprep.subr.bf16.mxu0 %v1832_v44 }
  0xf8   :  { %1628 = vmatmul.mubr.msk.f32.gmra.mrb[4].mxu0 %vm212_vm2, %v196_v25 }
  0xf9   :  { %1630 = vmatprep.mubr.msk.f32.mxu0 %vm212_vm2, %v197_v26  ;;  %1835 = vmatpush3.bf16.msra.mxu0 %v1832_v44 }
  0xfa   :  { %1694 = vmatprep.subr.mxu0 %v615_v45 }
  0xfc   :  { %1631 = vmatmul.mubr.msk.f32.gmra.mrb[6].mxu0 %vm212_vm2, %v198_v27  ;;  %v1446_v27 = vld [vmem:[#allocation2 + $0xf0] ss:$0 sm:$0xff] }
  0xfd   :  { %1633 = vmatprep.mubr.msk.f32.mxu0 %vm212_vm2, %v199_v28  ;;  %1695 = vmatpush3.msra.mxu0 %v615_v45 }
 0x100   :  { %1634 = vmatmul.mubr.msk.f32.gmra.mrb[8].mxu0 %vm212_vm2, %v200_v29 }
 0x101   :  { %1636 = vmatprep.mubr.msk.f32.mxu0 %vm212_vm2, %v201_v30 }
 0x104   :  { %1637 = vmatmul.mubr.msk.f32.gmra.mrb[10].mxu0 %vm212_vm2, %v202_v31 }
 0x105   :  { %1639 = vmatprep.mubr.msk.f32.mxu0 %vm212_vm2, %v203_v32 }
 0x108   :  { %1640 = vmatmul.mubr.msk.f32.gmra.mrb[12].mxu0 %vm212_vm2, %v204_v33 }
 0x109   :  { %1642 = vmatprep.mubr.msk.f32.mxu0 %vm212_vm2, %v205_v34 }
 0x10c   :  { %1643 = vmatmul.mubr.msk.f32.gmra.mrb[14].mxu0 %vm212_vm2, %v206_v35 }
 0x1c7   :  { %v1626_v47 = vpop.f32.mrb[2].mxu0 }
 0x1c8   :  { %v327_v48 = vadd.f32 %v1626_v47, %v1431_v46  ;;  %v321_v49 = vpop.f32.mrb[3].mxu0 }
 0x1c9   :  { %v322_v50 = vadd.f32 %v1431_v46, %v321_v49 }
 0x1ca   :  { %v391_v53 = vmax.f32 %v327_v48, 0.0 }
 0x1cb   :  { %v390_v51 = vmax.f32 %v322_v50, 0.0  ;;  %v1629_v52 = vpop.f32.mrb[4].mxu0 }
 0x1cc   :  { %v337_v54 = vadd.f32 %v1629_v52, %v1431_v46  ;;  %v331_v55 = vpop.f32.mrb[5].mxu0 }
 0x1cd   :  { %v332_v56 = vadd.f32 %v1431_v46, %v331_v55  ;;  %1665 = vmatprep.mubr.msk.f32.mxu1 %vm419_vm3, %v390_v51 }
 0x1ce   :  { %1666 = vmatmul.mubr.msk.f32.vlgmr.msra.gmra.mrb[2].mxu1 %vm419_vm3, %v391_v53  ;;  %v393_v59 = vmax.f32 %v337_v54, 0.0 }
 0x1cf   :  { %v392_v57 = vmax.f32 %v332_v56, 0.0  ;;  %v1632_v58 = vpop.f32.mrb[6].mxu0 }
 0x1d0   :  { %v347_v60 = vadd.f32 %v1632_v58, %v1431_v46  ;;  %v341_v61 = vpop.f32.mrb[7].mxu0 }
 0x1d1   :  { %v342_v62 = vadd.f32 %v1431_v46, %v341_v61  ;;  %1668 = vmatprep.mubr.msk.f32.mxu1 %vm419_vm3, %v392_v57 }
 0x1d2   :  { %1669 = vmatmul.mubr.msk.f32.gmra.mrb[4].mxu1 %vm419_vm3, %v393_v59  ;;  %v395_v3 = vmax.f32 %v347_v60, 0.0 }
 0x1d3   :  { %v394_v63 = vmax.f32 %v342_v62, 0.0  ;;  %v1635_v0 = vpop.f32.mrb[8].mxu0 }
 0x1d4   :  { %v357_v4 = vadd.f32 %v1635_v0, %v1431_v46  ;;  %v351_v5 = vpop.f32.mrb[9].mxu0 }
 0x1d5   :  { %v352_v6 = vadd.f32 %v1431_v46, %v351_v5  ;;  %1671 = vmatprep.mubr.msk.f32.mxu1 %vm419_vm3, %v394_v63 }
 0x1d6   :  { %1672 = vmatmul.mubr.msk.f32.gmra.mrb[6].mxu1 %vm419_vm3, %v395_v3  ;;  %v397_v9 = vmax.f32 %v357_v4, 0.0 }
 0x1d7   :  { %v396_v7 = vmax.f32 %v352_v6, 0.0  ;;  %v1638_v8 = vpop.f32.mrb[10].mxu0 }
 0x1d8   :  { %v367_v10 = vadd.f32 %v1638_v8, %v1431_v46  ;;  %v361_v11 = vpop.f32.mrb[11].mxu0  ;;  %v813_v8 = vld [vmem:[#allocation2 + $0x70] sm:$0xff] }
 0x1d9   :  { %v362_v12 = vadd.f32 %v1431_v46, %v361_v11  ;;  %1674 = vmatprep.mubr.msk.f32.mxu1 %vm419_vm3, %v396_v7 }
 0x1da   :  { %1675 = vmatmul.mubr.msk.f32.gmra.mrb[8].mxu1 %vm419_vm3, %v397_v9  ;;  %v399_v15 = vmax.f32 %v367_v10, 0.0  ;;  %v1461_v9 = vld [vmem:[#allocation2 + $0x120] ss:$0 sm:$0xff] }
 0x1db   :  { %v398_v13 = vmax.f32 %v362_v12, 0.0  ;;  %v1641_v14 = vpop.f32.mrb[12].mxu0 }
 0x1dc   :  { %v377_v16 = vadd.f32 %v1641_v14, %v1431_v46  ;;  %v371_v17 = vpop.f32.mrb[13].mxu0 }
 0x1dd   :  { %v372_v18 = vadd.f32 %v1431_v46, %v371_v17  ;;  %1677 = vmatprep.mubr.msk.f32.mxu1 %vm419_vm3, %v398_v13 }
 0x1de   :  { %1678 = vmatmul.mubr.msk.f32.gmra.mrb[10].mxu1 %vm419_vm3, %v399_v15  ;;  %v401_v21 = vmax.f32 %v377_v16, 0.0 }
 0x1df   :  { %v400_v19 = vmax.f32 %v372_v18, 0.0  ;;  %v1644_v20 = vpop.f32.mrb[14].mxu0 }
 0x1e0   :  { %v387_v22 = vadd.f32 %v1644_v20, %v1431_v46  ;;  %v381_v23 = vpop.f32.mrb[15].mxu0 }
 0x1e1   :  { %v382_v24 = vadd.f32 %v1431_v46, %v381_v23  ;;  %1680 = vmatprep.mubr.msk.f32.mxu1 %vm419_vm3, %v400_v19 }
 0x1e2   :  { %1681 = vmatmul.mubr.msk.f32.gmra.mrb[12].mxu1 %vm419_vm3, %v401_v21  ;;  %v403_v26 = vmax.f32 %v387_v22, 0.0 }
 0x1e3   :  { %v402_v25 = vmax.f32 %v382_v24, 0.0 }
 0x1e5   :  { %1683 = vmatprep.mubr.msk.f32.mxu1 %vm419_vm3, %v402_v25 }
 0x1e6   :  { %1684 = vmatmul.mubr.msk.f32.gmra.mrb[14].mxu1 %vm419_vm3, %v403_v26 }
 0x1e7   :  { %1745 = vmatprep.mubr.msk.f32.mxu1 %vm815_vm5, %v813_v8 }
 0x2a1   :  { %v1667_v28 = vpop.f32.mrb[2].mxu1 }
 0x2a2   :  { %v534_v29 = vadd.f32 %v1667_v28, %v1446_v27  ;;  %v528_v30 = vpop.f32.mrb[3].mxu1 }
 0x2a3   :  { %v529_v31 = vadd.f32 %v1446_v27, %v528_v30 }
 0x2a4   :  { %v598_v34 = vmax.f32 %v534_v29, 0.0 }
 0x2a5   :  { %v597_v32 = vmax.f32 %v529_v31, 0.0  ;;  %v1670_v33 = vpop.f32.mrb[4].mxu1 }
 0x2a6   :  { %v544_v35 = vadd.f32 %v1670_v33, %v1446_v27  ;;  %v538_v36 = vpop.f32.mrb[5].mxu1 }
 0x2a7   :  { %v539_v37 = vadd.f32 %v1446_v27, %v538_v36  ;;  %1696 = vmatprep.mubr.msk.f32.mxu0 %vm621_vm4, %v597_v32 }
 0x2a8   :  { %1697 = vmatmul.mubr.msk.f32.vlgmr.msra.gmra.mrb[16].mxu0 %vm621_vm4, %v598_v34  ;;  %v600_v40 = vmax.f32 %v544_v35, 0.0 }
 0x2a9   :  { %v599_v38 = vmax.f32 %v539_v37, 0.0  ;;  %v1673_v39 = vpop.f32.mrb[6].mxu1 }
 0x2aa   :  { %v554_v41 = vadd.f32 %v1673_v39, %v1446_v27  ;;  %v548_v42 = vpop.f32.mrb[7].mxu1 }
 0x2ab   :  { %v549_v43 = vadd.f32 %v1446_v27, %v548_v42  ;;  %1699 = vmatprep.mubr.msk.f32.mxu0 %vm621_vm4, %v599_v38 }
 0x2ac   :  { %1700 = vmatmul.mubr.msk.f32.gmra.mrb[18].mxu0 %vm621_vm4, %v600_v40  ;;  %v602_v46 = vmax.f32 %v554_v41, 0.0 }
 0x2ad   :  { %v601_v44 = vmax.f32 %v549_v43, 0.0  ;;  %v1676_v45 = vpop.f32.mrb[8].mxu1 }
 0x2ae   :  { %v564_v47 = vadd.f32 %v1676_v45, %v1446_v27  ;;  %v558_v48 = vpop.f32.mrb[9].mxu1 }
 0x2af   :  { %v559_v49 = vadd.f32 %v1446_v27, %v558_v48  ;;  %1702 = vmatprep.mubr.msk.f32.mxu0 %vm621_vm4, %v601_v44 }
 0x2b0   :  { %1703 = vmatmul.mubr.msk.f32.gmra.mrb[20].mxu0 %vm621_vm4, %v602_v46  ;;  %v604_v52 = vmax.f32 %v564_v47, 0.0 }
 0x2b1   :  { %v603_v50 = vmax.f32 %v559_v49, 0.0  ;;  %v1679_v51 = vpop.f32.mrb[10].mxu1 }
 0x2b2   :  { %v574_v53 = vadd.f32 %v1679_v51, %v1446_v27  ;;  %v568_v54 = vpop.f32.mrb[11].mxu1 }
 0x2b3   :  { %v569_v55 = vadd.f32 %v1446_v27, %v568_v54  ;;  %1705 = vmatprep.mubr.msk.f32.mxu0 %vm621_vm4, %v603_v50 }
 0x2b4   :  { %1706 = vmatmul.mubr.msk.f32.gmra.mrb[22].mxu0 %vm621_vm4, %v604_v52  ;;  %v606_v58 = vmax.f32 %v574_v53, 0.0 }
 0x2b5   :  { %v605_v56 = vmax.f32 %v569_v55, 0.0  ;;  %v1682_v57 = vpop.f32.mrb[12].mxu1 }
 0x2b6   :  { %v584_v59 = vadd.f32 %v1682_v57, %v1446_v27  ;;  %v578_v60 = vpop.f32.mrb[13].mxu1  ;;  %v898_v57 = vld [vmem:[#allocation2 + $0x130] sm:$0xff] }
 0x2b7   :  { %v579_v61 = vadd.f32 %v1446_v27, %v578_v60  ;;  %1708 = vmatprep.mubr.msk.f32.mxu0 %vm621_vm4, %v605_v56 }
 0x2b8   :  { %1709 = vmatmul.mubr.msk.f32.gmra.mrb[24].mxu0 %vm621_vm4, %v606_v58  ;;  %v608_v0 = vmax.f32 %v584_v59, 0.0  ;;  %v899_v58 = vld [vmem:[#allocation2 + $0x138] sm:$0xff] }
 0x2b9   :  { %v607_v62 = vmax.f32 %v579_v61, 0.0  ;;  %v1685_v63 = vpop.f32.mrb[14].mxu1  ;;  %v1864_v61 = vpack.c.bf16 %v899_v58, %v898_v57 }
 0x2ba   :  { %v594_v3 = vadd.f32 %v1685_v63, %v1446_v27  ;;  %v588_v4 = vpop.f32.mrb[15].mxu1  ;;  %v900_v63 = vld [vmem:[#allocation2 + $0x140] sm:$0xf] }
 0x2bb   :  { %v589_v5 = vadd.f32 %v1446_v27, %v588_v4  ;;  %1711 = vmatprep.mubr.msk.f32.mxu0 %vm621_vm4, %v607_v62  ;;  %v814_v62 = vld [vmem:[#allocation2 + $0x78] sm:$0xff] }
 0x2bc   :  { %1712 = vmatmul.mubr.msk.f32.gmra.mrb[26].mxu0 %vm621_vm4, %v608_v0  ;;  %v610_v7 = vmax.f32 %v594_v3, 0.0  ;;  %v897_v0 = vld [vmem:[#allocation2 + $0x128] sm:$0xf]  ;;  %v1073_v3 = vld [vmem:[#allocation2 + $0x150] sm:$0xff]  ;;  %v1074_v4 = vld [vmem:[#allocation2 + $0x158] sm:$0xff] }
 0x2bd   :  { %v609_v6 = vmax.f32 %v589_v5, 0.0  ;;  %v1075_v5 = vld [vmem:[#allocation2 + $0x160] sm:$0xff] }
 0x2bf   :  { %1714 = vmatprep.mubr.msk.f32.mxu0 %vm621_vm4, %v609_v6  ;;  %v1868_v6 = vpack.c.bf16 %v1074_v4, %v1073_v3 }
 0x2c0   :  { %1715 = vmatmul.mubr.msk.f32.gmra.mrb[28].mxu0 %vm621_vm4, %v610_v7  ;;  %v1076_v7 = vld [vmem:[#allocation2 + $0x168] sm:$0xff] }
 0x2c1   :  { %v1872_v8 = vpack.c.bf16 %v1076_v7, %v1075_v5  ;;  %1869 = vmatprep.subr.bf16.mxu0 %v1868_v6 }
 0x2c2   :  { %1871 = vmatpush3.bf16.msra.mxu0 %v1868_v6 }
 0x2c3   :  { %1873 = vmatprep.subr.bf16.mxu0 %v1872_v8 }
 0x2c6   :  { %1875 = vmatpush3.bf16.msra.mxu0 %v1872_v8 }
 0x37b   :  { %v1698_v10 = vpop.f32.mrb[16].mxu0 }
 0x37c   :  { %v736_v11 = vadd.f32 %v1698_v10, %v1461_v9  ;;  %v730_v12 = vpop.f32.mrb[17].mxu0 }
 0x37d   :  { %v731_v13 = vadd.f32 %v1461_v9, %v730_v12  ;;  %v1484_v12 = vld [vmem:[#allocation2 + $0x148] ss:$0 sm:$0xff] }
 0x37e   :  { %v800_v14 = vmax.f32 %v736_v11, 0.0 }
 0x37f   :  { %v799_v15 = vmax.f32 %v731_v13, 0.0  ;;  %v1701_v16 = vpop.f32.mrb[18].mxu0 }
 0x380   :  { %v746_v17 = vadd.f32 %v1701_v16, %v1461_v9  ;;  %v740_v18 = vpop.f32.mrb[19].mxu0 }
 0x381   :  { %v1836_v19 = vpack.c.bf16 %v800_v14, %v799_v15  ;;  %v741_v20 = vadd.f32 %v1461_v9, %v740_v18 }
 0x382   :  { %v802_v21 = vmax.f32 %v746_v17, 0.0 }
 0x383   :  { %v801_v22 = vmax.f32 %v741_v20, 0.0  ;;  %v1704_v23 = vpop.f32.mrb[20].mxu0  ;;  %1837 = vmatprep.subr.bf16.mxu1 %v1836_v19  ;;  %v1167_v20 = vld [vmem:[#allocation2 + $0x188] sm:$0xff] }
 0x384   :  { %v756_v24 = vadd.f32 %v1704_v23, %v1461_v9  ;;  %v750_v25 = vpop.f32.mrb[21].mxu0  ;;  %1839 = vmatpush3.bf16.msra.mxu1 %v1836_v19  ;;  %v1166_v19 = vld [vmem:[#allocation2 + $0x180] sm:$0xff] }
 0x385   :  { %v1840_v26 = vpack.c.bf16 %v802_v21, %v801_v22  ;;  %v751_v27 = vadd.f32 %v1461_v9, %v750_v25  ;;  %v1876_v21 = vpack.c.bf16 %v1167_v20, %v1166_v19 }
 0x386   :  { %v804_v28 = vmax.f32 %v756_v24, 0.0 }
 0x387   :  { %v803_v29 = vmax.f32 %v751_v27, 0.0  ;;  %v1707_v30 = vpop.f32.mrb[22].mxu0  ;;  %1841 = vmatprep.subr.bf16.mxu1 %v1840_v26 }
 0x388   :  { %v766_v31 = vadd.f32 %v1707_v30, %v1461_v9  ;;  %v760_v32 = vpop.f32.mrb[23].mxu0  ;;  %1843 = vmatpush3.bf16.msra.mxu1 %v1840_v26  ;;  %v1335_v30 = vld [vmem:[#allocation2 + $0x1a0] sm:$0xff] }
 0x389   :  { %v1844_v33 = vpack.c.bf16 %v804_v28, %v803_v29  ;;  %v761_v34 = vadd.f32 %v1461_v9, %v760_v32  ;;  %v1921_v28 = vmov 0.0|0.0   ;;  %v1923_v29 = vmov 0.0  }
 0x38a   :  { %v806_v35 = vmax.f32 %v766_v31, 0.0  ;;  %v1336_v31 = vld [vmem:[#allocation2 + $0x1a8] sm:$0xff] }
 0x38b   :  { %v805_v36 = vmax.f32 %v761_v34, 0.0  ;;  %v1710_v37 = vpop.f32.mrb[24].mxu0  ;;  %1845 = vmatprep.subr.bf16.mxu1 %v1844_v33  ;;  %v1884_v32 = vpack.c.bf16 %v1336_v31, %v1335_v30 }
 0x38c   :  { %v776_v38 = vadd.f32 %v1710_v37, %v1461_v9  ;;  %v770_v39 = vpop.f32.mrb[25].mxu0  ;;  %1847 = vmatpush3.bf16.msra.mxu1 %v1844_v33  ;;  %v1488_v33 = vld [vmem:[#allocation2 + $0x198] ss:$0 sm:$0xff] }
 0x38d   :  { %v1848_v40 = vpack.c.bf16 %v806_v35, %v805_v36  ;;  %v771_v41 = vadd.f32 %v1461_v9, %v770_v39 }
 0x38e   :  { %v808_v42 = vmax.f32 %v776_v38, 0.0 }
 0x38f   :  { %v807_v43 = vmax.f32 %v771_v41, 0.0  ;;  %v1713_v44 = vpop.f32.mrb[26].mxu0  ;;  %1849 = vmatprep.subr.bf16.mxu1 %v1848_v40  ;;  %v1260_v41 = vld [vmem:[#allocation2 + $0x80] sm:$0xff] }
 0x390   :  { %v786_v45 = vadd.f32 %v1713_v44, %v1461_v9  ;;  %v780_v46 = vpop.f32.mrb[27].mxu0  ;;  %1851 = vmatpush3.bf16.msra.mxu1 %v1848_v40 }
 0x391   :  { %v1852_v47 = vpack.c.bf16 %v808_v42, %v807_v43  ;;  %v781_v48 = vadd.f32 %v1461_v9, %v780_v46  ;;  %v1337_v42 = vld [vmem:[#allocation2 + $0x1b0] sm:$0xf] }
 0x392   :  { %v810_v49 = vmax.f32 %v786_v45, 0.0  ;;  %v1493_v45 = vld [vmem:[#allocation2 + $0x1b8] ss:$0 sm:$0xff] }
 0x393   :  { %v809_v50 = vmax.f32 %v781_v48, 0.0  ;;  %v1716_v51 = vpop.f32.mrb[28].mxu0  ;;  %1853 = vmatprep.subr.bf16.mxu1 %v1852_v47 }
 0x394   :  { %v796_v52 = vadd.f32 %v1716_v51, %v1461_v9  ;;  %v790_v53 = vpop.f32.mrb[29].mxu0  ;;  %1855 = vmatpush3.bf16.msra.mxu1 %v1852_v47 }
 0x395   :  { %v1856_v54 = vpack.c.bf16 %v810_v49, %v809_v50  ;;  %v791_v55 = vadd.f32 %v1461_v9, %v790_v53  ;;  %v1077_v9 = vld [vmem:[#allocation2 + $0x170] sm:$0xff] }
 0x396   :  { %v812_v56 = vmax.f32 %v796_v52, 0.0  ;;  %1770 = vmatprep.subr.mxu0 %v1077_v9 }
 0x397   :  { %v811_v59 = vmax.f32 %v791_v55, 0.0  ;;  %1857 = vmatprep.subr.bf16.mxu1 %v1856_v54  ;;  %1771 = vmatpush3.msra.mxu0 %v1077_v9 }
 0x398   :  { %1859 = vmatpush3.bf16.msra.mxu1 %v1856_v54  ;;  %1880 = vmatprep.subr.bf16.mxu0 %v1921_v28 }
 0x399   :  { %v1860_v60 = vpack.c.bf16 %v812_v56, %v811_v59 }
 0x39b   :  { %1861 = vmatprep.subr.bf16.mxu1 %v1860_v60 }
 0x39c   :  { %1863 = vmatpush3.bf16.msra.mxu1 %v1860_v60 }
 0x39d   :  { %1865 = vmatprep.subr.bf16.mxu1 %v1864_v61 }
 0x39f   :  { %1746 = vmatmul.mubr.msk.f32.vlgmr.msra.gmra.mrb[16].mxu1 %vm815_vm5, %v814_v62 }
 0x3a0   :  { %1867 = vmatpush3.bf16.msra.mxu1 %v1864_v61 }
 0x3a1   :  { %1752 = vmatprep.subr.msk.mxu1 %vm35_vm0, %v900_v63 }
 0x3a4   :  { %1753 = vmatpush3.msk.msra.mxu1 %vm35_vm0, %v900_v63 }
 0x3a5   :  { %1757 = vmatprep.subr.msk.mxu1 %vm35_vm0, %v897_v0 }
 0x472   :  { %v1747_v10 = vpop.f32.mrb[16].mxu1 }
 0x473   :  { %v888_v11 = vpop.f32.mrb[17].mxu1 }
 0x474   :  { %1754 = vmatprep.mubr.msk.f32.mxu1 %vm901_vm6, %v888_v11 }
 0x475   :  { %1755 = vmatmul.mubr.msk.f32.vlgmr.msra.gmra.mrb[18].mxu1 %vm901_vm6, %v1747_v10 }
 0x476   :  { %1758 = vmatpush3.msk.msra.mxu1 %vm35_vm0, %v897_v0  ;;  %1759 = vmatprep.mubr.msk.f32.mxu1 %vm28_vm1, %v1954_v1  ;;  %v1168_v1 = vld [vmem:[#allocation2 + $0x190] sm:$0xf] }
 0x477   :  { %1877 = vmatprep.subr.bf16.mxu1 %v1876_v21 }
 0x47d   :  { %1760 = vmatmul.mubr.msk.f32.vlgmr.msra.gmra.mrb[18].mxu1 %vm28_vm1, %v1959_v2  ;;  %v1485_v2 = vld [vmem:[#allocation2 + $0x178] ss:$0 sm:$0xff] }
 0x47e   :  { %1879 = vmatpush3.bf16.msra.mxu1 %v1876_v21 }
 0x47f   :  { %1779 = vmatprep.subr.msk.mxu1 %vm35_vm0, %v1168_v1 }
 0x482   :  { %1780 = vmatpush3.msk.msra.mxu1 %vm35_vm0, %v1168_v1 }
 0x483   :  { %1883 = vmatprep.subr.bf16.mxu1 %v1921_v28 }
 0x550   :  { %v1761_v13 = vpop.f32.mrb[18].mxu1 }
 0x551   :  { %v1070_v14 = vadd.f32 %v1761_v13, %v1484_v12  ;;  %v1055_v15 = vpop.f32.mrb[19].mxu1 }
 0x552   :  { %v1069_v16 = vadd.f32 %v1484_v12, %v1055_v15 }
 0x553   :  { %v1072_v18 = vmax.f32 %v1070_v14, 0.0 }
 0x554   :  { %v1071_v17 = vmax.f32 %v1069_v16, 0.0 }
 0x556   :  { %1772 = vmatprep.mubr.msk.f32.mxu0 %vm621_vm4, %v1071_v17 }
 0x557   :  { %1773 = vmatmul.mubr.msk.f32.vlgmr.msra.gmra.mrb[30].mxu0 %vm621_vm4, %v1072_v18 }
 0x558   :  { %1788 = vmatprep.mubr.msk.f32.mxu0 %vm1922_vm7, %v1923_v29 }
 0x62a   :  { %v1774_v22 = vpop.f32.mrb[30].mxu0 }
 0x62b   :  { %v1161_v23 = vadd.f32 %v1774_v22, %v1485_v2  ;;  %v1155_v24 = vpop.f32.mrb[31].mxu0 }
 0x62c   :  { %v1156_v25 = vadd.f32 %v1485_v2, %v1155_v24 }
 0x62d   :  { %v1165_v27 = vmax.f32 %v1161_v23, 0.0 }
 0x62e   :  { %v1164_v26 = vmax.f32 %v1156_v25, 0.0 }
 0x630   :  { %1781 = vmatprep.mubr.msk.f32.mxu1 %vm901_vm6, %v1164_v26 }
 0x631   :  { %1782 = vmatmul.mubr.msk.f32.vlgmr.msra.gmra.mrb[20].mxu1 %vm901_vm6, %v1165_v27 }
 0x632   :  { %1797 = vmatprep.mubr.msk.f32.mxu1 %vm1922_vm7, %v1923_v29  ;;  %1885 = vmatpush3.bf16.msra.mxu1 %v1884_v32 }
 0x633   :  { %1795 = vmatprep.subr.mxu1 %v1923_v29 }
 0x636   :  { %1796 = vmatpush3.msk.msra.mxu1 %vm35_vm0, %v1337_v42 }
 0x704   :  { %v1783_v34 = vpop.f32.mrb[20].mxu1 }
 0x705   :  { %v1255_v35 = vadd.f32 %v1783_v34, %v1488_v33  ;;  %v1249_v36 = vpop.f32.mrb[21].mxu1 }
 0x706   :  { %v1250_v37 = vadd.f32 %v1488_v33, %v1249_v36 }
 0x707   :  { %v1259_v38 = vmax.f32 %v1255_v35, 0.0 }
 0x708   :  { %v1258_v39 = vmax.f32 %v1250_v37, 0.0 }
 0x70a   :  { %v1881_v40 = vpack.c.bf16 %v1259_v38, %v1258_v39 }
 0x70c   :  { %1882 = vmatpush3.bf16.msra.mxu0 %v1881_v40 }
 0x70f   :  { %1789 = vmatmul.mubr.msk.f32.vlgmr.msra.gmra.mrb[32].mxu0 %vm1261_vm8, %v1260_v41 }
 0x7e2   :  { %v1331_v43 = vpop.f32.mrb[32].mxu0 }
 0x7e3   :  { %v1790_v44 = vpop.f32.mrb[33].mxu0  ;;  %1798 = vmatmul.mubr.msk.f32.vlgmr.msra.gmra.mrb[22].mxu1 %vm901_vm6, %v1331_v43 }
 0x8b6   :  { %v1415_v46 = vpop.f32.mrb[22].mxu1 }
 0x8b7   :  { %v1416_v47 = vadd.f32 %v1493_v45, %v1415_v46  ;;  %v1799_v48 = vpop.f32.mrb[23].mxu1 }
 0x8b9   :  { %1419 = vst [vmem:[%s2040_s2] sm:$0xff] %v1416_v47 }
 0x8ba   :  { %1424 = vsyncpa [#allocation3], 1 }

</bundles_post_ra>
